<compile_context>
chip_gen: v6e
topology: v6e:2x2x1
jax: 0.10.0
libtpu: 0.0.40
codegen_flags: <defaults>
</compile_context>

<pallas_src>
import functools

import jax
import jax.numpy as jnp
from jax import lax
from jax.experimental import pallas as pl
from jax.experimental.pallas import tpu as pltpu

_LANES = 128
_ACC_SUBLANES = 8
_CHUNK_ROWS = 512                       # inner compute chunk (f32 temps ~256 KiB)
_TARGET_BLOCK_BYTES = 4 * 1024 * 1024   # HBM->VMEM block per input per grid step


def _round_up(v, m):
    return (v + m - 1) // m * m


def _round_down(v, m):
    return (v // m) * m


def _num_tensorcores_per_device():
    # v7x exposes 2 TensorCores behind one device; v5e/v6e have 1.
    # Conservative fallback of 1 is always correct.
    try:
        kind = jax.devices()[0].device_kind.lower()
    except Exception:
        return 1
    return 2 if "v7" in kind else 1


def _shrinkage_sum_kernel(x_ref, y_ref, o_ref, acc_ref, *,
                          a, c, rows, block_rows, chunk_rows, steps,
                          needs_mask):
    """Accumulate sum(l^2 * sigmoid(a*(l-c))) over this core's blocks into an
    (8,128) lane-dense partial; the wrapper finishes the mean."""
    p = pl.program_id(0)      # TensorCore split (size 1 on 1-TC chips)
    i = pl.program_id(1)      # reduction steps handled by this core

    @pl.when(i == 0)
    def _():
        acc_ref[...] = jnp.zeros_like(acc_ref)

    blk = p * steps + i                  # logical block index (may overhang)
    block_start = blk * block_rows       # first logical row of this block
    num_chunks = block_rows // chunk_rows
    half_a = 0.5 * a

    def _accum(r0, mask_rows):
        # Cast in-kernel: inputs stream from HBM at their native width.
        x = x_ref[pl.ds(r0, chunk_rows), :].astype(jnp.float32)
        y = y_ref[pl.ds(r0, chunk_rows), :].astype(jnp.float32)
        l = jnp.abs(x - y)
        # l^2 / (1 + exp(a*(c-l))) == l^2 * sigmoid(a*(l-c)); tanh form keeps
        # the transcendental on the EUP slot and avoids the f32 divide.
        sig = 0.5 * jnp.tanh(half_a * (l - c)) + 0.5
        term = (l * l) * sig
        if mask_rows:
            # Zero rows past the logical end of the array (garbage rows of a
            # partial edge block, or a fully overhanging clamped block).
            row_ids = lax.broadcasted_iota(jnp.int32, (chunk_rows, _LANES), 0)
            term = jnp.where(block_start + r0 + row_ids < rows, term, 0.0)
        # Fold into a single vreg-shaped running sum (VPU adds only; no
        # per-step cross-lane reduce, no scalar read-modify-write).
        acc_ref[...] += term.reshape(
            chunk_rows // _ACC_SUBLANES, _ACC_SUBLANES, _LANES).sum(axis=0)

    def _run(mask_rows):
        if num_chunks == 1:
            _accum(0, mask_rows)
        else:
            def body(ci, carry):
                _accum(pl.multiple_of(ci * chunk_rows, chunk_rows), mask_rows)
                return carry
            lax.fori_loop(0, num_chunks, body, 0)

    if needs_mask:
        block_is_full = block_start + block_rows <= rows

        @pl.when(block_is_full)
        def _():
            _run(False)          # hot path: no iota / compare / select

        @pl.when(jnp.logical_not(block_is_full))
        def _():
            _run(True)           # edge / overhang block only
    else:
        _run(False)

    @pl.when(i == steps - 1)
    def _():
        o_ref[...] = acc_ref[...]


def shrinkage_loss(x, y, a=10.0, c=0.2):
    """Pallas implementation of ShrinkageLoss.forward. Returns a scalar f32."""
    assert x.shape == y.shape, "input and target must have the same shape"
    n = x.size

    xf = x.reshape(-1)
    yf = y.reshape(-1)

    # Lane-dense slab (rows, 128). Zero-copy (pure reshape) whenever n is a
    # multiple of 128 and spans at least one (16,128) tile; otherwise pad
    # minimally (<= 127 elements, or up to one tile for tiny inputs). Zero
    # padding contributes exactly 0 to the numerator sum.
    # TODO(synk): a fully zero-copy path for n % 128 != 0 would need in-kernel
    # 1-D tail handling; the pad here is at most 127 elements of copy per input
    # beyond the tiny-input case.
    min_elems = 16 * _LANES
    padded = _round_up(max(n, min_elems), _LANES)
    if padded != n:
        xf = jnp.pad(xf, (0, padded - n))
        yf = jnp.pad(yf, (0, padded - n))
    rows = padded // _LANES
    x2 = xf.reshape(rows, _LANES)
    y2 = yf.reshape(rows, _LANES)

    # Block sizing: ~4 MiB per input per grid step (8 MiB streamed/step) keeps
    # the ~0.35 us fixed per-step overhead small at HBM roofline; the in-kernel
    # chunk loop bounds VMEM temporaries regardless of block size. Blocks never
    # exceed the array (edge blocks are partial and masked in-kernel).
    itemsize = jnp.dtype(x2.dtype).itemsize
    target_rows = max(_CHUNK_ROWS, _TARGET_BLOCK_BYTES // (_LANES * itemsize))
    base = _round_down(rows, 16)              # >= 16 by construction
    if base >= _CHUNK_ROWS:
        chunk_rows = _CHUNK_ROWS
        block_rows = _round_down(min(target_rows, base), _CHUNK_ROWS)
    else:
        chunk_rows = base
        block_rows = base

    num_blocks = pl.cdiv(rows, block_rows)
    ncores = _num_tensorcores_per_device()
    if num_blocks < 2:
        ncores = 1
    steps = pl.cdiv(num_blocks, ncores)

    needs_mask = (rows % block_rows != 0) or (num_blocks % ncores != 0)
    if num_blocks % ncores == 0:
        in_map = lambda p, i: (p * steps + i, 0)
    else:
        # At most one overhanging block: clamp its index so the DMA stays in
        # bounds; the kernel's row mask zeroes its contribution.
        in_map = lambda p, i: (jnp.minimum(p * steps + i, num_blocks - 1), 0)

    kernel = functools.partial(
        _shrinkage_sum_kernel,
        a=float(a), c=float(c), rows=rows, block_rows=block_rows,
        chunk_rows=chunk_rows, steps=steps, needs_mask=needs_mask)

    partials = pl.pallas_call(
        kernel,
        out_shape=jax.ShapeDtypeStruct((ncores, _ACC_SUBLANES, _LANES),
                                       jnp.float32),
        grid_spec=pltpu.PrefetchScalarGridSpec(
            num_scalar_prefetch=0,
            grid=(ncores, steps),
            in_specs=[
                pl.BlockSpec((block_rows, _LANES), in_map),
                pl.BlockSpec((block_rows, _LANES), in_map),
            ],
            out_specs=pl.BlockSpec((None, _ACC_SUBLANES, _LANES),
                                   lambda p, i: (p, 0, 0)),
            scratch_shapes=[pltpu.VMEM((_ACC_SUBLANES, _LANES), jnp.float32)],
        ),
        compiler_params=pltpu.CompilerParams(
            dimension_semantics=("parallel", "arbitrary"),
            # 2 inputs x 2 pipeline buffers x 4 MiB blocks = 16 MiB plus small
            # chunk temporaries; 32 MiB clears v5e's 16 MiB default scoped
            # limit and stays within every generation's physical VMEM.
            vmem_limit_bytes=32 * 1024 * 1024,
        ),
    )(x2, y2)

    # Mean over the ORIGINAL number of elements (pad/mask contributed zero).
    return (jnp.sum(partials) / jnp.float32(n)).astype(jnp.float32)


def _reference_loss(x, y, a=10.0, c=0.2):
    xf = x.astype(jnp.float32)
    yf = y.astype(jnp.float32)
    l = jnp.abs(xf - yf)
    return jnp.mean((l * l) / (1.0 + jnp.exp(a * (c - l))))


if __name__ == "__main__":
    # Primary small NCHW example (the loss is applied to dense prediction tensors).
    kx, ky = jax.random.split(jax.random.PRNGKey(0))
    x = jax.random.normal(kx, (2, 4, 16, 16), dtype=jnp.float32)
    y = jax.random.normal(ky, (2, 4, 16, 16), dtype=jnp.float32)

    loss = jax.block_until_ready(shrinkage_loss(x, y, a=10.0, c=0.2))
    ref = _reference_loss(x, y, a=10.0, c=0.2)
    assert jnp.allclose(loss, ref, rtol=1e-5, atol=1e-6), (loss, ref)

    # bf16 inputs: cast happens inside the kernel (HBM traffic stays bf16).
    loss_bf = jax.block_until_ready(
        shrinkage_loss(x.astype(jnp.bfloat16), y.astype(jnp.bfloat16)))
    ref_bf = _reference_loss(x.astype(jnp.bfloat16), y.astype(jnp.bfloat16))
    assert jnp.allclose(loss_bf, ref_bf, rtol=1e-5, atol=1e-6), (loss_bf, ref_bf)

    # Larger shapes exercising the partial-tail mask, the multi-block path and
    # (on 2-TC devices) the core split; plus a lane-misaligned size hitting the
    # minimal-pad path.
    for shape, seed in [((4, 8, 96, 100), 1), ((4, 8, 128, 130), 2),
                        ((7, 9, 11), 3)]:
        ka, kb = jax.random.split(jax.random.PRNGKey(seed))
        xa = jax.random.normal(ka, shape, dtype=jnp.float32)
        yb = jax.random.normal(kb, shape, dtype=jnp.float32)
        got = jax.block_until_ready(shrinkage_loss(xa, yb))
        want = _reference_loss(xa, yb)
        assert jnp.allclose(got, want, rtol=1e-4, atol=1e-6), (shape, got, want)

    print("KERNEL_OK")
</pallas_src>

<mosaic_0001>
module attributes {stable_mosaic.version = 11 : i64} {
  func.func @_shrinkage_sum_kernel(%arg0: i32, %arg1: i32, %arg2: memref<16x128xf32, #tpu.memory_space<vmem>>, %arg3: memref<16x128xf32, #tpu.memory_space<vmem>>, %arg4: memref<1x8x128xf32, #tpu.memory_space<vmem>>, %arg5: memref<8x128xf32, #tpu.memory_space<vmem>>) attributes {dimension_semantics = [#tpu.dimension_semantics<parallel>, #tpu.dimension_semantics<arbitrary>], iteration_bounds = array<i64: 1, 1>, scalar_prefetch = 0 : i64, scratch_operands = 1 : i64, tpu.core_type = #tpu.core_type<tc>, window_params = [{transform_indices = @transform_0, window_bounds = array<i64: 16, 128>}, {transform_indices = @transform_1, window_bounds = array<i64: 16, 128>}, {transform_indices = @transform_2, window_bounds = array<i64: 1, 8, 128>}]} {
    %c0_i32 = arith.constant 0 : i32
    %0 = arith.cmpi eq, %arg1, %c0_i32 : i32
    %1 = arith.extui %0 : i1 to i32
    %c0_i32_0 = arith.constant 0 : i32
    %2 = arith.cmpi ne, %1, %c0_i32_0 : i32
    scf.if %2 {
      %cst_14 = arith.constant 0.000000e+00 : f32
      %26 = vector.broadcast %cst_14 : f32 to vector<8x128xf32>
      %c0_15 = arith.constant 0 : index
      %c0_16 = arith.constant 0 : index
      %27 = vector.load %arg5[%c0_15, %c0_16] : memref<8x128xf32, #tpu.memory_space<vmem>>, vector<8x128xf32>
      tpu.vector_store %arg5[%c0_15, %c0_16], %26 {strides = array<i32>} : memref<8x128xf32, #tpu.memory_space<vmem>>, vector<8x128xf32>,
    } else {
    }
    %c0 = arith.constant 0 : index
    %c0_1 = arith.constant 0 : index
    %3 = vector.load %arg2[%c0, %c0_1] : memref<16x128xf32, #tpu.memory_space<vmem>>, vector<16x128xf32>
    %c0_2 = arith.constant 0 : index
    %c0_3 = arith.constant 0 : index
    %4 = vector.load %arg3[%c0_2, %c0_3] : memref<16x128xf32, #tpu.memory_space<vmem>>, vector<16x128xf32>
    %5 = arith.subf %3, %4 : vector<16x128xf32>
    %6 = math.absf %5 : vector<16x128xf32>
    %cst = arith.constant 2.000000e-01 : f32
    %7 = vector.broadcast %cst : f32 to vector<16x128xf32>
    %8 = arith.subf %6, %7 : vector<16x128xf32>
    %cst_4 = arith.constant 5.000000e+00 : f32
    %9 = vector.broadcast %cst_4 : f32 to vector<16x128xf32>
    %10 = arith.mulf %9, %8 : vector<16x128xf32>
    %11 = math.tanh %10 : vector<16x128xf32>
    %cst_5 = arith.constant 5.000000e-01 : f32
    %12 = vector.broadcast %cst_5 : f32 to vector<16x128xf32>
    %13 = arith.mulf %12, %11 : vector<16x128xf32>
    %cst_6 = arith.constant 5.000000e-01 : f32
    %14 = vector.broadcast %cst_6 : f32 to vector<16x128xf32>
    %15 = arith.addf %13, %14 : vector<16x128xf32>
    %16 = arith.mulf %6, %6 : vector<16x128xf32>
    %17 = arith.mulf %16, %15 : vector<16x128xf32>
    %c0_7 = arith.constant 0 : index
    %c0_8 = arith.constant 0 : index
    %18 = vector.load %arg5[%c0_7, %c0_8] : memref<8x128xf32, #tpu.memory_space<vmem>>, vector<8x128xf32>
    %19 = vector.shape_cast %17 : vector<16x128xf32> to vector<2x8x128xf32>
    %cst_9 = arith.constant dense<0.000000e+00> : vector<8x128xf32>
    %20 = vector.multi_reduction <add>, %19, %cst_9 [0] : vector<2x8x128xf32> to vector<8x128xf32>
    %21 = arith.addf %18, %20 : vector<8x128xf32>
    %c0_10 = arith.constant 0 : index
    %c0_11 = arith.constant 0 : index
    %22 = vector.load %arg5[%c0_10, %c0_11] : memref<8x128xf32, #tpu.memory_space<vmem>>, vector<8x128xf32>
    tpu.vector_store %arg5[%c0_10, %c0_11], %21 {strides = array<i32>} : memref<8x128xf32, #tpu.memory_space<vmem>>, vector<8x128xf32>,
    %c0_i32_12 = arith.constant 0 : i32
    %23 = arith.cmpi eq, %arg1, %c0_i32_12 : i32
    %24 = arith.extui %23 : i1 to i32
    %c0_i32_13 = arith.constant 0 : i32
    %25 = arith.cmpi ne, %24, %c0_i32_13 : i32
    scf.if %25 {
      %c0_14 = arith.constant 0 : index
      %c0_15 = arith.constant 0 : index
      %26 = vector.load %arg5[%c0_14, %c0_15] : memref<8x128xf32, #tpu.memory_space<vmem>>, vector<8x128xf32>
      %c0_16 = arith.constant 0 : index
      %c0_17 = arith.constant 0 : index
      %c0_18 = arith.constant 0 : index
      %27 = vector.load %arg4[%c0_16, %c0_17, %c0_18] : memref<1x8x128xf32, #tpu.memory_space<vmem>>, vector<1x8x128xf32>
      %28 = vector.shape_cast %27 : vector<1x8x128xf32> to vector<8x128xf32>
      %29 = vector.shape_cast %26 : vector<8x128xf32> to vector<1x8x128xf32>
      tpu.vector_store %arg4[%c0_16, %c0_17, %c0_18], %29 {strides = array<i32>} : memref<1x8x128xf32, #tpu.memory_space<vmem>>, vector<1x8x128xf32>,
    } else {
    }
    return
  }
  func.func @transform_0(%arg0: i32, %arg1: i32) -> (i32, i32) {
    %c1_i32 = arith.constant 1 : i32
    %0 = arith.muli %arg0, %c1_i32 : i32
    %1 = arith.addi %0, %arg1 : i32
    %c0_i32 = arith.constant 0 : i32
    %c0_i32_0 = arith.constant 0 : i32
    return %1, %c0_i32 : i32, i32
  }
  func.func @transform_1(%arg0: i32, %arg1: i32) -> (i32, i32) {
    %c1_i32 = arith.constant 1 : i32
    %0 = arith.muli %arg0, %c1_i32 : i32
    %1 = arith.addi %0, %arg1 : i32
    %c0_i32 = arith.constant 0 : i32
    %c0_i32_0 = arith.constant 0 : i32
    return %1, %c0_i32 : i32, i32
  }
  func.func @transform_2(%arg0: i32, %arg1: i32) -> (i32, i32, i32) {
    %c0_i32 = arith.constant 0 : i32
    %c0_i32_0 = arith.constant 0 : i32
    %c0_i32_1 = arith.constant 0 : i32
    return %arg0, %c0_i32, %c0_i32_0 : i32, i32, i32
  }
}

</mosaic_0001>

<bundles_post_ra>
// kernel: tpu_custom_call.1
= control target key start
LH: loop header
LB: loop body
LE: loop exit
PB: predicated region body
PF: predicated region fallthrough
CT: control target
= control target key end

     0   :  { %7 = vsyncpa [#allocation4], 0  ;;  %s210_s0 = inlined_call_operand.hbm [shape: f32[16,128], index: 0, kind: input, shape index: {}]   ;;  %s211_s1 = inlined_call_operand.hbm [shape: f32[16,128], index: 1, kind: input, shape index: {}]   ;;  %s212_s2 = inlined_call_operand.hbm [shape: f32[1,8,128], index: 2, kind: output, shape index: {}]  }
   0x1   :  { %8 = vsyncpa [#allocation7], 0 }
   0x2   :  { %9 = vsyncpa [#allocation5], 0  ;;  %s181_s9 = smov [#allocation3]  }
   0x3   :  { %s19_s10 = sshll.u32 %s181_s9, 4  ;;  %s20_s10 = int_to_ptr.vmem [resolvable:$true] %s19_s10 }
   0x4   :  { %s123_s11 = scalar_lea.vmem %s20_s10, 256  ;;  %p128_p1 = scmp.lt.s32.totalorder %s20_s10, %s20_s10 }
   0x5   :  { %p124_p0 = scmp.ne.s32.totalorder %s20_s10, %s123_s11  ;;  %p129_p2 = scmp.lt.s32.totalorder %s123_s11, %s123_s11 }
   0x7   :  { %p130_p3 = por %p129_p2, %p128_p1 }
   0x9   :  { %p131_p4 = pnand %p130_p3, %p124_p0 }
   0xb   :  { %134 = shalt.err (!%p131_p4)
}
   0xc   :  { %s182_s12 = smov 128   ;;  %s183_s13 = smov 8  }
   0xd   :  { %25 = dma.hbm_to_vmem [thread:$0]  %s210_s0, 256, %s20_s10, [#allocation4], %s182_s12, %s182_s12, %s183_s13  }
   0xe   :  { %s184_s16 = smov [#allocation6]  }
   0xf   :  { %s35_s17 = sshll.u32 %s184_s16, 4  ;;  %s36_s17 = int_to_ptr.vmem [resolvable:$true] %s35_s17 }
  0x10   :  { %s143_s18 = scalar_lea.vmem %s36_s17, 256  ;;  %p148_p6 = scmp.lt.s32.totalorder %s36_s17, %s36_s17 }
  0x11   :  { %p144_p5 = scmp.ne.s32.totalorder %s36_s17, %s143_s18  ;;  %p149_p7 = scmp.lt.s32.totalorder %s143_s18, %s143_s18 }
  0x13   :  { %p150_p8 = por %p149_p7, %p148_p6 }
  0x15   :  { %p151_p9 = pnand %p150_p8, %p144_p5 }
  0x17   :  { %154 = shalt.err (!%p151_p9)
}
  0x18   :  { %41 = dma.hbm_to_vmem [thread:$0]  %s211_s1, 256, %s36_s17, [#allocation7], %s182_s12, %s182_s12, %s183_s13  }
  0x19   :  { %175 = dma.done.wait [#allocation4], 256  }
  0x1a   :  { %176 = vsyncadd [#allocation4], 4294967040 }
  0x1b   :  { %177 = dma.done.wait [#allocation7], 256  }
  0x1c   :  { %178 = vsyncadd [#allocation7], 4294967040  ;;  %v57_v0 = vld [vmem:[#allocation3] sm:$0xff]  ;;  %v58_v1 = vld [vmem:[#allocation3 + $0x8] sm:$0xff]  ;;  %s185_s0 = smov [#allocation8]  }
  0x1d   :  { %v59_v2 = vld [vmem:[#allocation6] sm:$0xff]  ;;  %v60_v3 = vld [vmem:[#allocation6 + $0x8] sm:$0xff]  ;;  %s94_s1 = sshll.u32 %s185_s0, 4  ;;  %s95_s1 = int_to_ptr.vmem [resolvable:$true] %s94_s1 }
  0x1e   :  { %v61_v4 = vsub.f32 %v57_v0, %v59_v2  ;;  %v62_v5 = vsub.f32 %v58_v1, %v60_v3  ;;  %s155_s21 = scalar_lea.vmem %s95_s1, 128  ;;  %p160_p11 = scmp.lt.s32.totalorder %s95_s1, %s95_s1 }
  0x1f   :  { %p156_p10 = scmp.ne.s32.totalorder %s95_s1, %s155_s21  ;;  %p161_p12 = scmp.lt.s32.totalorder %s155_s21, %s155_s21 }
  0x20   :  { %v63_v6 = vand.u32 2147483647, %v61_v4  ;;  %v64_v7 = vand.u32 2147483647, %v62_v5 }
  0x21   :  { %p162_p13 = por %p161_p12, %p160_p11 }
  0x22   :  { %v104_v8 = vadd.f32 -0.2, %v63_v6  ;;  %v105_v9 = vadd.f32 -0.2, %v64_v7  ;;  %v75_v15 = vmul.f32 %v63_v6, %v63_v6  ;;  %v76_v17 = vmul.f32 %v64_v7, %v64_v7 }
  0x23   :  { %p163_p0 = pnand %p162_p13, %p156_p10 }
  0x24   :  { %v67_v10 = vmul.f32 5.0, %v104_v8  ;;  %v68_v11 = vmul.f32 5.0, %v105_v9 }
  0x26   :  { %111 = vtanh.f32 %v67_v10 }
  0x27   :  { %113 = vtanh.f32 %v68_v11 }
  0x33   :  { %v112_v12 = vpop.eup %111 }
  0x34   :  { %v114_v13 = vpop.eup %113  ;;  %v71_v14 = vmul.f32 0.5, %v112_v12 }
  0x35   :  { %v72_v16 = vmul.f32 0.5, %v114_v13 }
  0x36   :  { %v73_v18 = vadd.f32 0.5, %v71_v14 }
  0x37   :  { %v74_v19 = vadd.f32 0.5, %v72_v16 }
  0x38   :  { %v77_v20 = vmul.f32 %v75_v15, %v73_v18 }
  0x39   :  { %v78_v21 = vmul.f32 %v76_v17, %v74_v19 }
  0x3b   :  { %v80_v22 = vadd.f32 %v78_v21, %v77_v20 }
  0x3d   :  { %87 = vst [vmem:[#allocation8] sm:$0xff] %v80_v22 }
  0x3e   :  { %166 = shalt.err (!%p163_p0)
}
  0x3f   :  { %97 = dma.vmem_to_hbm [thread:$0]  %s95_s1, 128, %s212_s2, [#allocation5]  }
  0x40   :  { %179 = dma.done.wait [#allocation5], 128  }
  0x41   :  { %180 = vsyncadd [#allocation5], 4294967168 }
  0x42   :  { %101 = vsyncpa [#allocation4], 1 }
  0x43   :  { %102 = vsyncpa [#allocation7], 1 }
  0x44   :  { %103 = vsyncpa [#allocation5], 1 }

</bundles_post_ra>
